<compile_context>
chip_gen: v5e
topology: v5e:2x2
jax: 0.10.0
libtpu: 0.0.40
codegen_flags: <defaults>
</compile_context>

<pallas_src>
import math

import jax
import jax.numpy as jnp
from jax.experimental import pallas as pl
from jax.experimental.pallas import tpu as pltpu

_LANE = 128
_SUBLANE = 8


def make_positional_encoding(d_model: int, max_len: int = 1000,
                             dtype=jnp.float32) -> jnp.ndarray:
    """Build the (1, max_len, d_model) sinusoidal table (matches PyTorch init).

    Handles odd d_model (cos gets floor(d_model/2) columns).  Build it in the
    activation dtype so the forward pass needs no per-call convert kernel."""
    position = jnp.arange(0, max_len, dtype=jnp.float32)[:, None]          # (max_len, 1)
    div_term = jnp.exp(
        jnp.arange(0, d_model, 2, dtype=jnp.float32) * (-math.log(10000.0) / d_model)
    )                                                                      # (ceil(d/2),)
    angles = position * div_term                                           # (max_len, ceil(d/2))
    pe = jnp.zeros((max_len, d_model), dtype=jnp.float32)
    pe = pe.at[:, 0::2].set(jnp.sin(angles))
    pe = pe.at[:, 1::2].set(jnp.cos(angles[:, : d_model // 2]))
    return pe[None, :, :].astype(dtype)                                    # (1, max_len, d_model)


def _pe_add_kernel(x_ref, pe_ref, o_ref):
    # x_ref: (tb, ts, D) or (tb, tf); pe_ref: (1, ts, D) or (1, tf)
    # (broadcast over the leading batch axis); o_ref matches x_ref.
    o_ref[...] = (x_ref[...] + pe_ref[...]).astype(o_ref.dtype)


def _largest_divisor_at_most(n: int, cap: int) -> int:
    cap = max(1, min(n, cap))
    for k in range(cap, 0, -1):
        if n % k == 0:
            return k
    return 1


def _block_policy():
    """Per-generation block-size target and scoped-VMEM budget."""
    try:
        vmem_cap = int(pltpu.get_tpu_info().vmem_capacity_bytes)
        if vmem_cap <= 0:
            vmem_cap = 128 * 1024 * 1024
    except Exception:
        vmem_cap = 128 * 1024 * 1024
    if vmem_cap <= 80 * 1024 * 1024:
        # v7x-class: 64 MiB VMEM but 3.2 TB/s HBM -> bigger blocks amortize the
        # ~0.35 us per-grid-step overhead.
        target = 6 * 1024 * 1024
    else:
        # v5e/v6e: 128 MiB physical VMEM; 4 MiB tiles sit at ~86% of HBM roofline.
        target = 4 * 1024 * 1024
    budget = min(int(vmem_cap * 0.70), 80 * 1024 * 1024)
    return target, budget


def _vmem_limit(footprint: int, budget: int) -> int:
    limit = int(min(budget, max(32 << 20, 2 * footprint + (4 << 20))))
    return max(limit, footprint + (2 << 20))   # never below what we actually need


def _forward_3d(x, pe, target, budget):
    """x: (B, S, D) with D % 128 == 0; pe: (1, >=S, D)."""
    B, S, D = x.shape
    dtype = x.dtype
    itemsize = jnp.dtype(dtype).itemsize
    row_bytes = D * itemsize

    if pe.dtype == dtype:
        # Use the full table directly: the BlockSpec only DMAs the rows it
        # needs, so there is no per-call slice/convert kernel in the hot path.
        pe_use = pe
    else:
        # TODO(synk): build the table in the activation dtype at init
        # (make_positional_encoding(dtype=...)) to avoid this per-call cast.
        pe_use = pe[:, :S, :].astype(dtype)

    # Sequence tile (sublane axis): multiple of 8 sized to the byte target.
    if S >= _SUBLANE:
        ts_cap = max(_SUBLANE, (target // row_bytes) // _SUBLANE * _SUBLANE)
        ts = min(ts_cap, (S // _SUBLANE) * _SUBLANE)
    else:
        ts = S
        pe_use = pe_use[:, :S, :]   # block dim must equal the full dim when ts < 8
    # Batch tile (leading, non-tiled axis): grow it while a whole-S slab is cheap.
    tb = max(1, min(B, target // max(1, ts * row_bytes)))

    # Keep the double-buffered footprint (x + out + pe) inside the budget.
    while 4 * tb * ts * row_bytes + 2 * ts * row_bytes > budget:
        if tb > 1:
            tb = (tb + 1) // 2
        elif ts > _SUBLANE:
            ts = max(_SUBLANE, (ts // 2) // _SUBLANE * _SUBLANE)
        else:
            break

    # Guarantee >= 2 grid steps so a v7x megacore has work to shard.
    if pl.cdiv(S, ts) * pl.cdiv(B, tb) == 1:
        if S > _SUBLANE:
            ts = max(_SUBLANE, (((S + 1) // 2) + _SUBLANE - 1) // _SUBLANE * _SUBLANE)
        elif tb >= 2:
            tb = (tb + 1) // 2

    s_tiles = pl.cdiv(S, ts)
    b_tiles = pl.cdiv(B, tb)

    x_block = tb * ts * row_bytes
    pe_block = ts * row_bytes                       # sublane-dense: no padding blow-up
    footprint = 2 * (2 * x_block) + 2 * pe_block    # x, out, pe double-buffered

    return pl.pallas_call(
        _pe_add_kernel,
        out_shape=jax.ShapeDtypeStruct((B, S, D), dtype),
        grid_spec=pltpu.PrefetchScalarGridSpec(
            num_scalar_prefetch=0,
            grid=(s_tiles, b_tiles),     # batch innermost -> pe tile resident across batch
            in_specs=[
                pl.BlockSpec((tb, ts, D), lambda s, b: (b, s, 0)),   # x
                pl.BlockSpec((1, ts, D), lambda s, b: (0, s, 0)),    # pe (batch-broadcast)
            ],
            out_specs=pl.BlockSpec((tb, ts, D), lambda s, b: (b, s, 0)),
        ),
        compiler_params=pltpu.CompilerParams(
            dimension_semantics=("parallel", "parallel"),
            vmem_limit_bytes=_vmem_limit(footprint, budget),
        ),
        input_output_aliases={0: 0},
    )(x, pe_use)


def _forward_flat(x, pe, target, budget):
    """x: (B, S, D) with (S*D) % 128 == 0; lane-dense flattened add for small D."""
    B, S, D = x.shape
    dtype = x.dtype
    itemsize = jnp.dtype(dtype).itemsize
    F = S * D
    max_len = pe.shape[1]

    if pe.dtype == dtype:
        # Layout-preserving reshape (no copy): the first S*D flattened elements
        # of the table line up exactly with x's (S, D) flattening.
        pe2 = pe.reshape(1, max_len * D)
    else:
        # TODO(synk): build the table in the activation dtype at init to avoid this.
        pe2 = pe[:, :S, :].astype(dtype).reshape(1, F)
    x2 = x.reshape(B, F)

    native_sub = max(_SUBLANE, 32 // itemsize)      # 8 f32 / 16 bf16 / 32 int8

    def padded_rows(r):
        return ((r + native_sub - 1) // native_sub) * native_sub

    def footprint(tb_, tf_):
        # Account for the sublane padding of the 1-row pe block (8x/16x logical).
        return (4 * padded_rows(tb_) * tf_ * itemsize      # x + out, double-buffered
                + 2 * padded_rows(1) * tf_ * itemsize)     # pe, double-buffered

    m = F // _LANE
    lanes_cap = max(1, target // max(1, B * itemsize * _LANE))
    tf = _largest_divisor_at_most(m, lanes_cap) * _LANE
    if B <= _SUBLANE or B * tf * itemsize <= target:
        tb = B
    else:
        tb = min(B, max(_SUBLANE, (target // (tf * itemsize)) // _SUBLANE * _SUBLANE))

    # Keep the (padded) footprint within the scoped-VMEM budget.
    while footprint(tb, tf) > budget and tf > _LANE:
        tf = _largest_divisor_at_most(m, max(1, (tf // _LANE) // 2)) * _LANE

    # Guarantee >= 2 grid steps for the v7x megacore when possible.
    if pl.cdiv(F, tf) * pl.cdiv(B, tb) == 1:
        if m >= 2:
            tf = _largest_divisor_at_most(m, max(1, m // 2)) * _LANE
        elif B > _SUBLANE:
            tb = max(_SUBLANE, (B // 2) // _SUBLANE * _SUBLANE)

    f_tiles = pl.cdiv(F, tf)
    b_tiles = pl.cdiv(B, tb)

    out2 = pl.pallas_call(
        _pe_add_kernel,
        out_shape=jax.ShapeDtypeStruct((B, F), dtype),
        grid_spec=pltpu.PrefetchScalarGridSpec(
            num_scalar_prefetch=0,
            grid=(f_tiles, b_tiles),     # batch innermost -> pe tile resident across batch
            in_specs=[
                pl.BlockSpec((tb, tf), lambda f, b: (b, f)),   # x tile
                pl.BlockSpec((1, tf), lambda f, b: (0, f)),    # pe tile (batch-broadcast)
            ],
            out_specs=pl.BlockSpec((tb, tf), lambda f, b: (b, f)),
        ),
        compiler_params=pltpu.CompilerParams(
            dimension_semantics=("parallel", "parallel"),
            vmem_limit_bytes=_vmem_limit(footprint(tb, tf), budget),
        ),
        input_output_aliases={0: 0},
    )(x2, pe2)
    return out2.reshape(B, S, D)


def positional_encoding_forward(x: jnp.ndarray, pe: jnp.ndarray) -> jnp.ndarray:
    """x: (B, S, D); pe: (1, max_len, D).  Returns x + pe[:, :S, :] in x.dtype."""
    if x.ndim != 3:
        raise ValueError(f"expected (B, S, D) activations, got {x.shape}")
    B, S, D = x.shape
    if pe.ndim != 3 or pe.shape[0] != 1 or pe.shape[2] != D:
        raise ValueError(f"pe shape {pe.shape} incompatible with d_model={D}")
    if S > pe.shape[1]:
        raise ValueError(f"sequence length {S} exceeds positional table max_len {pe.shape[1]}")

    target, budget = _block_policy()

    if D % _LANE == 0:
        return _forward_3d(x, pe, target, budget)
    if (S * D) % _LANE == 0:
        return _forward_flat(x, pe, target, budget)

    # Non-128-aligned feature sizes (e.g. odd D): pad the feature axis up to the
    # next lane multiple so stores stay unmasked and tiling math applies, then
    # slice the padding back off.
    Dp = ((D + _LANE - 1) // _LANE) * _LANE
    x_p = jnp.pad(x, ((0, 0), (0, 0), (0, Dp - D)))
    pe_p = jnp.pad(pe[:, :S, :].astype(x.dtype), ((0, 0), (0, 0), (0, Dp - D)))
    return _forward_3d(x_p, pe_p, target, budget)[:, :, :D]


if __name__ == "__main__":
    key = jax.random.PRNGKey(0)
    max_len = 1000

    # Small shape consistent with the module: batch=2, seq=8, d_model=32
    # (exercises the lane-dense flatten path, D < 128).
    B, S, D = 2, 8, 32
    x = jax.random.normal(key, (B, S, D), dtype=jnp.float32)
    pe = make_positional_encoding(D, max_len=max_len)
    ref = x + pe[:, :S, :]                    # reference computed before the kernel call
    out = jax.block_until_ready(positional_encoding_forward(x, pe))
    assert out.shape == (B, S, D)
    assert out.dtype == x.dtype
    assert jnp.allclose(out, ref, atol=1e-6), "f32 mismatch vs reference"

    # Larger bf16 shape exercises the 3-D (D % 128 == 0) path; the table is
    # built in the activation dtype at init so the hot path has no cast/slice.
    B2, S2, D2 = 8, 1024, 256
    x_bf16 = jax.random.normal(jax.random.PRNGKey(0), (B2, S2, D2),
                               dtype=jnp.float32).astype(jnp.bfloat16)
    pe_big = make_positional_encoding(D2, max_len=2048, dtype=jnp.bfloat16)
    ref_bf16 = x_bf16 + pe_big[:, :S2, :]
    out_bf16 = jax.block_until_ready(positional_encoding_forward(x_bf16, pe_big))
    assert out_bf16.shape == (B2, S2, D2)
    assert out_bf16.dtype == jnp.bfloat16
    assert jnp.allclose(out_bf16.astype(jnp.float32),
                        ref_bf16.astype(jnp.float32), atol=1e-2), "bf16 mismatch"

    # Odd d_model exercises the lane-padding fallback path.
    B3, S3, D3 = 2, 8, 33
    x_odd = jax.random.normal(jax.random.PRNGKey(1), (B3, S3, D3), dtype=jnp.float32)
    pe_odd = make_positional_encoding(D3, max_len=16)
    assert pe_odd.shape == (1, 16, 33)
    ref_odd = x_odd + pe_odd[:, :S3, :]
    out_odd = jax.block_until_ready(positional_encoding_forward(x_odd, pe_odd))
    assert out_odd.shape == (B3, S3, D3)
    assert jnp.allclose(out_odd, ref_odd, atol=1e-6), "odd-D mismatch"

    print("KERNEL_OK")
</pallas_src>

<mosaic_0001>
module attributes {stable_mosaic.version = 11 : i64} {
  func.func @_pe_add_kernel(%arg0: i32, %arg1: i32, %arg2: memref<2x128xf32, #tpu.memory_space<vmem>>, %arg3: memref<1x128xf32, #tpu.memory_space<vmem>>, %arg4: memref<2x128xf32, #tpu.memory_space<vmem>>) attributes {dimension_semantics = [#tpu.dimension_semantics<parallel>, #tpu.dimension_semantics<parallel>], iteration_bounds = array<i64: 2, 1>, scalar_prefetch = 0 : i64, scratch_operands = 0 : i64, tpu.core_type = #tpu.core_type<tc>, window_params = [{transform_indices = @transform_0, window_bounds = array<i64: 2, 128>}, {transform_indices = @transform_1, window_bounds = array<i64: 1, 128>}, {transform_indices = @transform_2, window_bounds = array<i64: 2, 128>}]} {
    %c0 = arith.constant 0 : index
    %c0_0 = arith.constant 0 : index
    %0 = vector.load %arg2[%c0, %c0_0] : memref<2x128xf32, #tpu.memory_space<vmem>>, vector<2x128xf32>
    %c0_1 = arith.constant 0 : index
    %c0_2 = arith.constant 0 : index
    %1 = vector.load %arg3[%c0_1, %c0_2] : memref<1x128xf32, #tpu.memory_space<vmem>>, vector<1x128xf32>
    %2 = vector.broadcast %1 : vector<1x128xf32> to vector<2x128xf32>
    %3 = arith.addf %0, %2 : vector<2x128xf32>
    %c0_3 = arith.constant 0 : index
    %c0_4 = arith.constant 0 : index
    %4 = vector.load %arg4[%c0_3, %c0_4] : memref<2x128xf32, #tpu.memory_space<vmem>>, vector<2x128xf32>
    tpu.vector_store %arg4[%c0_3, %c0_4], %3 {strides = array<i32>} : memref<2x128xf32, #tpu.memory_space<vmem>>, vector<2x128xf32>,
    return
  }
  func.func @transform_0(%arg0: i32, %arg1: i32) -> (i32, i32) {
    %c0_i32 = arith.constant 0 : i32
    return %arg1, %arg0 : i32, i32
  }
  func.func @transform_1(%arg0: i32, %arg1: i32) -> (i32, i32) {
    %c0_i32 = arith.constant 0 : i32
    %c0_i32_0 = arith.constant 0 : i32
    return %c0_i32, %arg0 : i32, i32
  }
  func.func @transform_2(%arg0: i32, %arg1: i32) -> (i32, i32) {
    %c0_i32 = arith.constant 0 : i32
    return %arg1, %arg0 : i32, i32
  }
}

</mosaic_0001>

<bundles_post_ra>
// kernel: tpu_custom_call.1
= control target key start
LH: loop header
LB: loop body
LE: loop exit
PB: predicated region body
PF: predicated region fallthrough
CT: control target
= control target key end

     0   :  { %7 = vsyncpa [#allocation3], 0  ;;  %s714_s0 = inlined_call_operand.hbm [shape: f32[2,256], index: 0, kind: input, shape index: {}, may-alias: {0,2}]   ;;  %s715_s1 = inlined_call_operand.hbm [shape: f32[1,32000], index: 1, kind: input, shape index: {}]   ;;  %s716_s2 = inlined_call_operand.hbm [shape: f32[2,256], index: 2, kind: output, shape index: {}, may-alias: {0,2}]  }
   0x1   :  { %9 = vsyncpa [#allocation3 + $0x1], 0 }
   0x2   :  { %10 = vsyncpa [#allocation6], 0 }
   0x3   :  { %12 = vsyncpa [#allocation6 + $0x1], 0 }
   0x4   :  { %13 = vsyncpa [#allocation4], 0 }
   0x5   :  { %15 = vsyncpa [#allocation4 + $0x1], 0  ;;  %s584_s9 = smov 0   ;;  %s586_s10 = smov 0  }
   0x6   :  { %s588_s11 = smov 0   ;;  %s590_s12 = smov 0  }
   0x7   :  { %s592_s13 = smov 0   ;;  %s594_s14 = smov 0  }
   0x8 LB: > { %s340_s15 = sadd.s32 4294967295, %s567_s14   ;;  %s341_s16 = sadd.s32 4294967294, %s567_s14   ;;  %s567_s14 = sphi %s594_s14, %s21_s14   ;;  %s563_s13 = sphi %s592_s13, %s725_s13   ;;  %s559_s12 = sphi %s590_s12, %s724_s12   ;;  %s555_s11 = sphi %s588_s11, %s723_s11   ;;  %s551_s10 = sphi %s586_s10, %s722_s10   ;;  %s547_s9 = sphi %s584_s9, %s721_s9  }
   0x9   : > { %s33_s17 = sadd.s32 1, %s563_s13  ;;  %s42_s18 = sadd.s32 1, %s555_s11 }
   0xa   : > { %p35_p0 = scmp.ge.s32.totalorder %s33_s17, 2  ;;  %p49_p1 = scmp.ne.s32.totalorder %s555_s11, %s551_s10 }
   0xb   : > { %p50_p2 = scmp.eq.s32.totalorder %s567_s14, 0  ;;  %p55_p3 = scmp.ne.s32.totalorder %s551_s10, %s547_s9 }
   0xc   : > { %s727_s17 = smov (%p35_p0, %s33_s17), 0  ;;  %p56_p5 = scmp.eq.s32.totalorder %s340_s15, 0 }
   0xd   : > { %p625_p4 = por %p50_p2, %p49_p1  ;;  %s38_s20 = ssub.s32 %s563_s13, %s727_s17 }
   0xe   : > { %p107_p6 = scmp.eq.s32.totalorder %s340_s15, 1  ;;  %p40_p7 = scmp.eq.s32.totalorder %s38_s20, 0 }
   0xf   : > { %p631_p8 = por %p56_p5, %p55_p3  ;;  %p113_p10 = scmp.eq.s32.totalorder %s341_s16, 1 }
  0x10   : > { %p635_p9 = por %p107_p6, %p49_p1  ;;  %p343_p12 = scmp.ge.s32.totalorder %s567_s14, 2 }
  0x11   : > { %s640_s23 = scalar_select %p40_p7, %s555_s11, %s42_s18  }
  0x12   : > { %p642_p11 = por %p113_p10, %p55_p3  ;;  %p370_p13 = scmp.lt.s32.totalorder %s567_s14, 2 }
  0x13   : > { %s133_s25 = sand.u32 1, %s555_s11   ;;  %s345_s27 = sshll.u32 %s563_s13, 1 }
  0x14   : > { %s344_s26 = sshll.u32 %s133_s25, 1  ;;  %s143_s30 = scalar_lea.hbm %s714_s0, %s345_s27 }
  0x15   : > { %s137_s3 = scalar_lea.vmem [#allocation2], %s344_s26  ;;  %s145_s5 = sshll.u32 %s143_s30, 4  ;;  %s146_s5 = int_to_ptr.hbm [resolvable:$true] %s145_s5 }
  0x16   : > { %s147_s4 = sshll.u32 %s137_s3, 4  ;;  %p360_p0 = pnand %p370_p13, %p625_p4  ;;  %s148_s4 = int_to_ptr.vmem [resolvable:$true] %s147_s4 }
  0x17   : > { %p346_p1 = scmp.ge.s32.totalorder %s567_s14, 1  ;;  %p169_p2 = scmp.lt.s32.totalorder %s567_s14, 3 }
  0x18   : > { %s134_s6 = scalar_lea.sflag [#allocation3], %s133_s25  ;;  %s160_s15 = scalar_lea.hbm %s715_s1, %s563_s13 }
  0x19   : > { %362 = dma.hbm_to_vmem [thread:$0]  (!%p360_p0), %s146_s5, 32, %s148_s4, %s134_s6  }
  0x1a   : > { %p170_p3 = pnand %p346_p1, %p169_p2  ;;  %s157_s16 = scalar_lea.vmem [#allocation5], %s133_s25 }
  0x1b   : > { %s164_s18 = sshll.u32 %s157_s16, 4  ;;  %s162_s20 = sshll.u32 %s160_s15, 4  ;;  %s165_s18 = int_to_ptr.vmem [resolvable:$true] %s164_s18  ;;  %s163_s20 = int_to_ptr.hbm [resolvable:$true] %s162_s20 }
  0x1c   : > { %s155_s26 = scalar_lea.sflag [#allocation6], %s133_s25  ;;  %173 = sbr.rel (%p170_p3) target bundleno = 51 (0x33), region = 28 }
  0x1d   : > { %365 = dma.hbm_to_vmem [thread:$0]  (!%p360_p0), %s163_s20, 16, %s165_s18, %s155_s26  }
  0x1e   : > { %s662_s19 = sand.u32 (!%p170_p3), 1, %s551_s10  }
  0x1f   : > { %s347_s27 = sshll.u32 (!%p170_p3), %s662_s19, 1  ;;  %s176_s28 = scalar_lea.sflag (!%p170_p3), [#allocation3], %s662_s19 }
  0x20   : > { %s179_s29 = scalar_lea.vmem (!%p170_p3), [#allocation2], %s347_s27 }
  0x21   : > { %534 = dma.done.wait (%p631_p8), %s176_s28, 32  }
  0x22   : > { %536 = vsyncadd (%p631_p8), %s176_s28, 4294967264  ;;  %s186_s25 = scalar_lea.sflag [#allocation6], %s662_s19  ;;  %s188_s30 = scalar_lea.vmem [#allocation5], %s662_s19 }
  0x23   : > { %538 = dma.done.wait (%p631_p8), %s186_s25, 16  }
  0x24   : > { %540 = vsyncadd (%p631_p8), %s186_s25, 4294967280  ;;  %s350_s3 = sshll.u32 %s559_s12, 1  ;;  %s213_s7 = scalar_lea.vmem [#allocation7], %s347_s27  ;;  %v214_v0 = vld [vmem:[%s179_s29] sm:$0x3] }
  0x25   : > { %s234_s6 = scalar_lea.hbm %s716_s2, %s350_s3  ;;  %s236_s8 = sshll.u32 %s213_s7, 4  ;;  %v420_v1 = vld [vmem:[%s188_s30] ss:$0 sm:$0xff]  ;;  %s237_s8 = int_to_ptr.vmem [resolvable:$true] %s236_s8 }
  0x26   : > { %s238_s15 = sshll.u32 %s234_s6, 4  ;;  %v219_v2 = vadd.f32 %v420_v1, %v214_v0  ;;  %s222_s16 = scalar_lea.sflag [#allocation4], %s662_s19  ;;  %s239_s15 = int_to_ptr.hbm [resolvable:$true] %s238_s15 }
  0x27   : > { %s495_s21 = sshra.s32 %s239_s15, 4  ;;  %s501_s26 = scalar_lea.hbm %s716_s2, 4  ;;  %s496_s21 = int_to_ptr.hbm [resolvable:$true] %s495_s21 }
  0x28   : > { %220 = vst [vmem:[%s213_s7] sm:$0x3] %v219_v2  ;;  %s497_s18 = scalar_lea.hbm %s496_s21, 2  ;;  %p502_p7 = scmp.lt.s32.totalorder %s496_s21, %s716_s2 }
  0x29   : > { %p498_p4 = scmp.ne.s32.totalorder %s496_s21, %s497_s18  ;;  %p503_p8 = scmp.lt.s32.totalorder %s501_s26, %s497_s18 }
  0x2b   : > { %p499_p5 = pnand %p498_p4, %p635_p9  ;;  %p504_p10 = por %p503_p8, %p502_p7 }
  0x2d   : > { %p500_p6 = pneg %p499_p5 }
  0x2f   : > { %p505_p13 = pnand %p504_p10, %p500_p6 }
  0x31   : > { %508 = shalt.err (!%p505_p13)
}
  0x32   : > { %357 = dma.vmem_to_hbm [thread:$0]  (%p635_p9), %s237_s8, 32, %s239_s15, %s222_s16  }
  0x33 PF: > { %s250_s19 = sand.u32 1, %s547_s9   ;;  %p367_p0 = pnand %p343_p12, %p642_p11 }
  0x34   : > { %s251_s29 = scalar_lea.sflag [#allocation4], %s250_s19 }
  0x35   : > { %p368_p1 = pneg %p367_p0 }
  0x37   : > { %542 = dma.done.wait (%p368_p1), %s251_s29, 32  }
  0x38   : > { %544 = vsyncadd (%p368_p1), %s251_s29, 4294967264  ;;  %s21_s14 = sadd.s32 1, %s567_s14   ;;  %s721_s9 = smov %s551_s10 }
  0x39   : > { %p18_p2 = scmp.ge.s32.totalorder %s21_s14, 4   ;;  %s722_s10 = smov %s555_s11 }
  0x3a   : > { %s723_s11 = smov %s640_s23  ;;  %s724_s12 = smov %s563_s13 }
  0x3b   : > { %s725_s13 = smov %s727_s17  ;;  %20 = sbr.rel (!%p18_p2) target bundleno = 8 (0x8), region = 86 }
  0x40   :  { %257 = vsyncpa [#allocation3], 1 }
  0x41   :  { %259 = vsyncpa [#allocation3 + $0x1], 1 }
  0x42   :  { %260 = vsyncpa [#allocation6], 1 }
  0x43   :  { %262 = vsyncpa [#allocation6 + $0x1], 1 }
  0x44   :  { %263 = vsyncpa [#allocation4], 1 }
  0x45   :  { %265 = vsyncpa [#allocation4 + $0x1], 1 }

</bundles_post_ra>
